<compile_context>
chip_gen: v5e
topology: v5e:2x2
jax: 0.10.0
libtpu: 0.0.40
codegen_flags: <defaults>
</compile_context>

<pallas_src>
import functools

import jax
import jax.numpy as jnp
from jax.experimental import pallas as pl
from jax.experimental.pallas import tpu as pltpu


# ------------------------------ fused kernel --------------------------------

def _gcn3_fused_kernel(
    a0_ref, a1_ref, a2_ref, a3_ref, x0_ref,
    w0_ref, b0_ref,                      # concatenated conv0_{1,2,3}: (f_in, 3H), (1, 3H)
    w11_ref, b11_ref, w12_ref, b12_ref,  # conv1_1, conv1_2
    w21_ref, b21_ref, w22_ref, b22_ref,  # conv2_1, conv2_2
    w3_ref, b3_ref,                      # conv3
    o_ref,
    *, hidden,
):
    f32 = jnp.float32
    H = hidden

    def gconv(a, x, w, b):
        # relu(A @ X @ W + b).  Aggregate first: n_dst < n_src for every block
        # here, so (A @ X) @ W does strictly less MXU work.
        ax = jnp.dot(a, x, preferred_element_type=f32)
        return jnp.maximum(jnp.dot(ax, w, preferred_element_type=f32) + b, 0.0)

    a0 = a0_ref[...]
    a1 = a1_ref[...]
    a2 = a2_ref[...]
    a3 = a3_ref[...]
    x0 = x0_ref[...]

    # ---- layer 0: conv0_1 / conv0_2 / conv0_3 share (A0, x0) -> one fused matmul
    h0 = gconv(a0, x0, w0_ref[...], b0_ref[...])           # (n1, 3H)
    x1_1 = h0[:, 0:H]
    x1_2 = h0[:, H:2 * H]
    x1_3 = h0[:, 2 * H:3 * H]
    sum_1 = x1_1 + x1_2

    # ---- layer 1
    x2_1 = gconv(a1, sum_1, w11_ref[...], b11_ref[...])    # (n2, H)
    x2_2 = gconv(a1, x1_2, w12_ref[...], b12_ref[...])     # (n2, H)
    sum_2 = x2_1 + x2_2

    # ---- layer 2
    x3_1 = gconv(a2, sum_2, w21_ref[...], b21_ref[...])    # (n3, H)
    mean_x1_2 = jnp.mean(x1_2, keepdims=True)              # (1, 1) scalar, true count
    sum_2_2 = mean_x1_2 + x2_1                             # broadcast add
    x3_2 = gconv(a2, sum_2_2, w22_ref[...], b22_ref[...])  # (n3, H)

    mean_x1_3 = jnp.mean(x1_3, keepdims=True)              # (1, 1)
    sum_4 = x3_1 + x3_2 + mean_x1_3                        # (n3, H)

    # ---- layer 3: f_in (H) > f_out, so A @ (X @ W) is the cheaper order
    h3 = jnp.dot(sum_4, w3_ref[...], preferred_element_type=f32)      # (n3, f_out)
    x4 = jnp.maximum(jnp.dot(a3, h3, preferred_element_type=f32)
                     + b3_ref[...], 0.0)                              # (n4, f_out)
    o_ref[...] = x4.astype(o_ref.dtype)


# --------------------------------- wrapper -----------------------------------

def gcn3_forward(blocks, x0, params, hidden_features, out_features):
    """Full GCN_3 forward as a single fused Pallas call."""
    A0, A1, A2, A3 = blocks
    n4 = A3.shape[0]

    # Fold the three conv0 weights/biases into one lane-denser matmul.
    w0cat = jnp.concatenate(
        [params["conv0_1_w"], params["conv0_2_w"], params["conv0_3_w"]], axis=1)
    b0cat = jnp.concatenate(
        [params["conv0_1_b"], params["conv0_2_b"], params["conv0_3_b"]],
        axis=0).reshape(1, -1)

    def b2d(name):
        return params[name + "_b"].reshape(1, -1)

    args = (
        A0, A1, A2, A3, x0,
        w0cat, b0cat,
        params["conv1_1_w"], b2d("conv1_1"),
        params["conv1_2_w"], b2d("conv1_2"),
        params["conv2_1_w"], b2d("conv2_1"),
        params["conv2_2_w"], b2d("conv2_2"),
        params["conv3_w"], b2d("conv3"),
    )

    vmem = pl.BlockSpec(memory_space=pltpu.MemorySpace.VMEM)
    kernel = functools.partial(_gcn3_fused_kernel, hidden=hidden_features)
    return pl.pallas_call(
        kernel,
        out_shape=jax.ShapeDtypeStruct((n4, out_features), jnp.float32),
        in_specs=[vmem] * len(args),
        out_specs=vmem,
    )(*args)


# ----------------------------- reference (pure JAX) ---------------------------

def gcn3_reference(blocks, x0, params):
    def gconv(a, x, w, b):
        return jnp.maximum(a @ (x @ w) + b, 0.0)

    A0, A1, A2, A3 = blocks
    x1_1 = gconv(A0, x0, params["conv0_1_w"], params["conv0_1_b"])
    x1_2 = gconv(A0, x0, params["conv0_2_w"], params["conv0_2_b"])
    x1_3 = gconv(A0, x0, params["conv0_3_w"], params["conv0_3_b"])
    sum_1 = x1_1 + x1_2
    x2_1 = gconv(A1, sum_1, params["conv1_1_w"], params["conv1_1_b"])
    x2_2 = gconv(A1, x1_2, params["conv1_2_w"], params["conv1_2_b"])
    sum_2 = x2_1 + x2_2
    x3_1 = gconv(A2, sum_2, params["conv2_1_w"], params["conv2_1_b"])
    sum_2_2 = x1_2.mean() + x2_1
    x3_2 = gconv(A2, sum_2_2, params["conv2_2_w"], params["conv2_2_b"])
    sum_4 = x3_1 + x3_2 + x1_3.mean()
    return gconv(A3, sum_4, params["conv3_w"], params["conv3_b"])


# --------------------------- model construction -----------------------------

def make_norm_adj(key, n_dst, n_src):
    """Dense random bipartite block adjacency, normalized like GraphConv('both')."""
    a = jax.random.bernoulli(key, p=0.5, shape=(n_dst, n_src)).astype(jnp.float32)
    a = a.at[:, 0].set(1.0)                     # guarantee every dst has an in-edge
    deg_src = jnp.clip(a.sum(axis=0), 1.0)      # out-degree of src nodes
    deg_dst = jnp.clip(a.sum(axis=1), 1.0)      # in-degree of dst nodes
    return (deg_dst[:, None] ** -0.5) * a * (deg_src[None, :] ** -0.5)


def init_params(key, in_features, hidden_features, out_features):
    names_shapes = {
        "conv0_1": (in_features, hidden_features),
        "conv0_2": (in_features, hidden_features),
        "conv0_3": (in_features, hidden_features),
        "conv1_1": (hidden_features, hidden_features),
        "conv1_2": (hidden_features, hidden_features),
        "conv2_1": (hidden_features, hidden_features),
        "conv2_2": (hidden_features, hidden_features),
        "conv3": (hidden_features, out_features),
    }
    params = {}
    keys = jax.random.split(key, 2 * len(names_shapes))
    for i, (name, (fi, fo)) in enumerate(names_shapes.items()):
        kw, kb = keys[2 * i], keys[2 * i + 1]
        scale = (2.0 / (fi + fo)) ** 0.5        # xavier-ish, deterministic
        params[name + "_w"] = scale * jax.random.normal(kw, (fi, fo), jnp.float32)
        params[name + "_b"] = 0.01 * jax.random.normal(kb, (fo,), jnp.float32)
    return params


# --------------------------------- main --------------------------------------

if __name__ == "__main__":
    in_features, hidden_features, out_features = 8, 32, 16
    # node counts per layer frontier: n0 -> n1 -> n2 -> n3 -> n4
    node_counts = [16, 12, 10, 8, 6]

    key = jax.random.PRNGKey(0)
    k_feat, k_param, *k_blocks = jax.random.split(key, 2 + 4)

    x0 = jax.random.normal(k_feat, (node_counts[0], in_features), jnp.float32)
    blocks = [
        make_norm_adj(k_blocks[i], node_counts[i + 1], node_counts[i])
        for i in range(4)
    ]
    params = init_params(k_param, in_features, hidden_features, out_features)

    out = gcn3_forward(blocks, x0, params, hidden_features, out_features)
    out = jax.block_until_ready(out)

    assert out.shape == (node_counts[4], out_features)
    assert bool(jnp.all(jnp.isfinite(out)))

    ref = gcn3_reference(blocks, x0, params)
    assert bool(jnp.allclose(out, ref, rtol=1e-3, atol=1e-3)), (
        f"max abs err {float(jnp.max(jnp.abs(out - ref)))}")

    print("KERNEL_OK")
</pallas_src>

<mosaic_0001>
module attributes {stable_mosaic.version = 11 : i64} {
  func.func @_gcn3_fused_kernel(%arg0: memref<12x16xf32, #tpu.memory_space<vmem>>, %arg1: memref<10x12xf32, #tpu.memory_space<vmem>>, %arg2: memref<8x10xf32, #tpu.memory_space<vmem>>, %arg3: memref<6x8xf32, #tpu.memory_space<vmem>>, %arg4: memref<16x8xf32, #tpu.memory_space<vmem>>, %arg5: memref<8x96xf32, #tpu.memory_space<vmem>>, %arg6: memref<1x96xf32, #tpu.memory_space<vmem>>, %arg7: memref<32x32xf32, #tpu.memory_space<vmem>>, %arg8: memref<1x32xf32, #tpu.memory_space<vmem>>, %arg9: memref<32x32xf32, #tpu.memory_space<vmem>>, %arg10: memref<1x32xf32, #tpu.memory_space<vmem>>, %arg11: memref<32x32xf32, #tpu.memory_space<vmem>>, %arg12: memref<1x32xf32, #tpu.memory_space<vmem>>, %arg13: memref<32x32xf32, #tpu.memory_space<vmem>>, %arg14: memref<1x32xf32, #tpu.memory_space<vmem>>, %arg15: memref<32x16xf32, #tpu.memory_space<vmem>>, %arg16: memref<1x16xf32, #tpu.memory_space<vmem>>, %arg17: memref<6x16xf32, #tpu.memory_space<vmem>>) attributes {dimension_semantics = [], scalar_prefetch = 0 : i64, scratch_operands = 0 : i64, tpu.core_type = #tpu.core_type<tc>} {
    %c0 = arith.constant 0 : index
    %c0_0 = arith.constant 0 : index
    %0 = vector.load %arg0[%c0, %c0_0] : memref<12x16xf32, #tpu.memory_space<vmem>>, vector<12x16xf32>
    %c0_1 = arith.constant 0 : index
    %c0_2 = arith.constant 0 : index
    %1 = vector.load %arg1[%c0_1, %c0_2] : memref<10x12xf32, #tpu.memory_space<vmem>>, vector<10x12xf32>
    %c0_3 = arith.constant 0 : index
    %c0_4 = arith.constant 0 : index
    %2 = vector.load %arg2[%c0_3, %c0_4] : memref<8x10xf32, #tpu.memory_space<vmem>>, vector<8x10xf32>
    %c0_5 = arith.constant 0 : index
    %c0_6 = arith.constant 0 : index
    %3 = vector.load %arg3[%c0_5, %c0_6] : memref<6x8xf32, #tpu.memory_space<vmem>>, vector<6x8xf32>
    %c0_7 = arith.constant 0 : index
    %c0_8 = arith.constant 0 : index
    %4 = vector.load %arg4[%c0_7, %c0_8] : memref<16x8xf32, #tpu.memory_space<vmem>>, vector<16x8xf32>
    %c0_9 = arith.constant 0 : index
    %c0_10 = arith.constant 0 : index
    %5 = vector.load %arg5[%c0_9, %c0_10] : memref<8x96xf32, #tpu.memory_space<vmem>>, vector<8x96xf32>
    %c0_11 = arith.constant 0 : index
    %c0_12 = arith.constant 0 : index
    %6 = vector.load %arg6[%c0_11, %c0_12] : memref<1x96xf32, #tpu.memory_space<vmem>>, vector<1x96xf32>
    %cst = arith.constant dense<0.000000e+00> : vector<12x8xf32>
    %7 = tpu.matmul %0, %4, %cst {dimension_numbers = #tpu.dot_dimension_numbers<[1], [0], [0], [1], [0, 0, 1, 1], [], []>} : vector<12x16xf32>, vector<16x8xf32>, vector<12x8xf32> -> vector<12x8xf32>
    %cst_13 = arith.constant dense<0.000000e+00> : vector<12x96xf32>
    %8 = tpu.matmul %7, %5, %cst_13 {dimension_numbers = #tpu.dot_dimension_numbers<[1], [0], [0], [1], [0, 0, 1, 1], [], []>} : vector<12x8xf32>, vector<8x96xf32>, vector<12x96xf32> -> vector<12x96xf32>
    %9 = vector.broadcast %6 : vector<1x96xf32> to vector<12x96xf32>
    %10 = arith.addf %8, %9 : vector<12x96xf32>
    %cst_14 = arith.constant 0.000000e+00 : f32
    %11 = vector.broadcast %cst_14 : f32 to vector<12x96xf32>
    %12 = arith.maximumf %10, %11 : vector<12x96xf32>
    %13 = vector.extract_strided_slice %12 {offsets = [0, 0], sizes = [12, 32], strides = [1, 1]} : vector<12x96xf32> to vector<12x32xf32>
    %14 = vector.extract_strided_slice %12 {offsets = [0, 32], sizes = [12, 32], strides = [1, 1]} : vector<12x96xf32> to vector<12x32xf32>
    %15 = vector.extract_strided_slice %12 {offsets = [0, 64], sizes = [12, 32], strides = [1, 1]} : vector<12x96xf32> to vector<12x32xf32>
    %16 = arith.addf %13, %14 : vector<12x32xf32>
    %c0_15 = arith.constant 0 : index
    %c0_16 = arith.constant 0 : index
    %17 = vector.load %arg7[%c0_15, %c0_16] : memref<32x32xf32, #tpu.memory_space<vmem>>, vector<32x32xf32>
    %c0_17 = arith.constant 0 : index
    %c0_18 = arith.constant 0 : index
    %18 = vector.load %arg8[%c0_17, %c0_18] : memref<1x32xf32, #tpu.memory_space<vmem>>, vector<1x32xf32>
    %cst_19 = arith.constant dense<0.000000e+00> : vector<10x32xf32>
    %19 = tpu.matmul %1, %16, %cst_19 {dimension_numbers = #tpu.dot_dimension_numbers<[1], [0], [0], [1], [0, 0, 1, 1], [], []>} : vector<10x12xf32>, vector<12x32xf32>, vector<10x32xf32> -> vector<10x32xf32>
    %cst_20 = arith.constant dense<0.000000e+00> : vector<10x32xf32>
    %20 = tpu.matmul %19, %17, %cst_20 {dimension_numbers = #tpu.dot_dimension_numbers<[1], [0], [0], [1], [0, 0, 1, 1], [], []>} : vector<10x32xf32>, vector<32x32xf32>, vector<10x32xf32> -> vector<10x32xf32>
    %21 = vector.broadcast %18 : vector<1x32xf32> to vector<10x32xf32>
    %22 = arith.addf %20, %21 : vector<10x32xf32>
    %cst_21 = arith.constant 0.000000e+00 : f32
    %23 = vector.broadcast %cst_21 : f32 to vector<10x32xf32>
    %24 = arith.maximumf %22, %23 : vector<10x32xf32>
    %c0_22 = arith.constant 0 : index
    %c0_23 = arith.constant 0 : index
    %25 = vector.load %arg9[%c0_22, %c0_23] : memref<32x32xf32, #tpu.memory_space<vmem>>, vector<32x32xf32>
    %c0_24 = arith.constant 0 : index
    %c0_25 = arith.constant 0 : index
    %26 = vector.load %arg10[%c0_24, %c0_25] : memref<1x32xf32, #tpu.memory_space<vmem>>, vector<1x32xf32>
    %cst_26 = arith.constant dense<0.000000e+00> : vector<10x32xf32>
    %27 = tpu.matmul %1, %14, %cst_26 {dimension_numbers = #tpu.dot_dimension_numbers<[1], [0], [0], [1], [0, 0, 1, 1], [], []>} : vector<10x12xf32>, vector<12x32xf32>, vector<10x32xf32> -> vector<10x32xf32>
    %cst_27 = arith.constant dense<0.000000e+00> : vector<10x32xf32>
    %28 = tpu.matmul %27, %25, %cst_27 {dimension_numbers = #tpu.dot_dimension_numbers<[1], [0], [0], [1], [0, 0, 1, 1], [], []>} : vector<10x32xf32>, vector<32x32xf32>, vector<10x32xf32> -> vector<10x32xf32>
    %29 = vector.broadcast %26 : vector<1x32xf32> to vector<10x32xf32>
    %30 = arith.addf %28, %29 : vector<10x32xf32>
    %cst_28 = arith.constant 0.000000e+00 : f32
    %31 = vector.broadcast %cst_28 : f32 to vector<10x32xf32>
    %32 = arith.maximumf %30, %31 : vector<10x32xf32>
    %33 = arith.addf %24, %32 : vector<10x32xf32>
    %c0_29 = arith.constant 0 : index
    %c0_30 = arith.constant 0 : index
    %34 = vector.load %arg11[%c0_29, %c0_30] : memref<32x32xf32, #tpu.memory_space<vmem>>, vector<32x32xf32>
    %c0_31 = arith.constant 0 : index
    %c0_32 = arith.constant 0 : index
    %35 = vector.load %arg12[%c0_31, %c0_32] : memref<1x32xf32, #tpu.memory_space<vmem>>, vector<1x32xf32>
    %cst_33 = arith.constant dense<0.000000e+00> : vector<8x32xf32>
    %36 = tpu.matmul %2, %33, %cst_33 {dimension_numbers = #tpu.dot_dimension_numbers<[1], [0], [0], [1], [0, 0, 1, 1], [], []>} : vector<8x10xf32>, vector<10x32xf32>, vector<8x32xf32> -> vector<8x32xf32>
    %cst_34 = arith.constant dense<0.000000e+00> : vector<8x32xf32>
    %37 = tpu.matmul %36, %34, %cst_34 {dimension_numbers = #tpu.dot_dimension_numbers<[1], [0], [0], [1], [0, 0, 1, 1], [], []>} : vector<8x32xf32>, vector<32x32xf32>, vector<8x32xf32> -> vector<8x32xf32>
    %38 = vector.broadcast %35 : vector<1x32xf32> to vector<8x32xf32>
    %39 = arith.addf %37, %38 : vector<8x32xf32>
    %cst_35 = arith.constant 0.000000e+00 : f32
    %40 = vector.broadcast %cst_35 : f32 to vector<8x32xf32>
    %41 = arith.maximumf %39, %40 : vector<8x32xf32>
    %42 = vector.shape_cast %14 : vector<12x32xf32> to vector<1x12x32xf32>
    %cst_36 = arith.constant dense<0.000000e+00> : vector<1xf32>
    %43 = vector.multi_reduction <add>, %42, %cst_36 [1, 2] : vector<1x12x32xf32> to vector<1xf32>
    %44 = vector.shape_cast %43 : vector<1xf32> to vector<1x1x1xf32>
    %45 = vector.extract %44[0, 0, 0] : f32 from vector<1x1x1xf32>
    %46 = vector.broadcast %45 : f32 to vector<1x1xf32>
    %cst_37 = arith.constant 3.840000e+02 : f32
    %47 = vector.broadcast %cst_37 : f32 to vector<1x1xf32>
    %48 = arith.divf %46, %47 : vector<1x1xf32>
    %49 = vector.broadcast %48 : vector<1x1xf32> to vector<10x32xf32>
    %50 = arith.addf %49, %24 : vector<10x32xf32>
    %c0_38 = arith.constant 0 : index
    %c0_39 = arith.constant 0 : index
    %51 = vector.load %arg13[%c0_38, %c0_39] : memref<32x32xf32, #tpu.memory_space<vmem>>, vector<32x32xf32>
    %c0_40 = arith.constant 0 : index
    %c0_41 = arith.constant 0 : index
    %52 = vector.load %arg14[%c0_40, %c0_41] : memref<1x32xf32, #tpu.memory_space<vmem>>, vector<1x32xf32>
    %cst_42 = arith.constant dense<0.000000e+00> : vector<8x32xf32>
    %53 = tpu.matmul %2, %50, %cst_42 {dimension_numbers = #tpu.dot_dimension_numbers<[1], [0], [0], [1], [0, 0, 1, 1], [], []>} : vector<8x10xf32>, vector<10x32xf32>, vector<8x32xf32> -> vector<8x32xf32>
    %cst_43 = arith.constant dense<0.000000e+00> : vector<8x32xf32>
    %54 = tpu.matmul %53, %51, %cst_43 {dimension_numbers = #tpu.dot_dimension_numbers<[1], [0], [0], [1], [0, 0, 1, 1], [], []>} : vector<8x32xf32>, vector<32x32xf32>, vector<8x32xf32> -> vector<8x32xf32>
    %55 = vector.broadcast %52 : vector<1x32xf32> to vector<8x32xf32>
    %56 = arith.addf %54, %55 : vector<8x32xf32>
    %cst_44 = arith.constant 0.000000e+00 : f32
    %57 = vector.broadcast %cst_44 : f32 to vector<8x32xf32>
    %58 = arith.maximumf %56, %57 : vector<8x32xf32>
    %59 = vector.shape_cast %15 : vector<12x32xf32> to vector<1x12x32xf32>
    %cst_45 = arith.constant dense<0.000000e+00> : vector<1xf32>
    %60 = vector.multi_reduction <add>, %59, %cst_45 [1, 2] : vector<1x12x32xf32> to vector<1xf32>
    %61 = vector.shape_cast %60 : vector<1xf32> to vector<1x1x1xf32>
    %62 = vector.extract %61[0, 0, 0] : f32 from vector<1x1x1xf32>
    %63 = vector.broadcast %62 : f32 to vector<1x1xf32>
    %cst_46 = arith.constant 3.840000e+02 : f32
    %64 = vector.broadcast %cst_46 : f32 to vector<1x1xf32>
    %65 = arith.divf %63, %64 : vector<1x1xf32>
    %66 = arith.addf %41, %58 : vector<8x32xf32>
    %67 = vector.broadcast %65 : vector<1x1xf32> to vector<8x32xf32>
    %68 = arith.addf %66, %67 : vector<8x32xf32>
    %c0_47 = arith.constant 0 : index
    %c0_48 = arith.constant 0 : index
    %69 = vector.load %arg15[%c0_47, %c0_48] : memref<32x16xf32, #tpu.memory_space<vmem>>, vector<32x16xf32>
    %cst_49 = arith.constant dense<0.000000e+00> : vector<8x16xf32>
    %70 = tpu.matmul %68, %69, %cst_49 {dimension_numbers = #tpu.dot_dimension_numbers<[1], [0], [0], [1], [0, 0, 1, 1], [], []>} : vector<8x32xf32>, vector<32x16xf32>, vector<8x16xf32> -> vector<8x16xf32>
    %cst_50 = arith.constant dense<0.000000e+00> : vector<6x16xf32>
    %71 = tpu.matmul %3, %70, %cst_50 {dimension_numbers = #tpu.dot_dimension_numbers<[1], [0], [0], [1], [0, 0, 1, 1], [], []>} : vector<6x8xf32>, vector<8x16xf32>, vector<6x16xf32> -> vector<6x16xf32>
    %c0_51 = arith.constant 0 : index
    %c0_52 = arith.constant 0 : index
    %72 = vector.load %arg16[%c0_51, %c0_52] : memref<1x16xf32, #tpu.memory_space<vmem>>, vector<1x16xf32>
    %73 = vector.broadcast %72 : vector<1x16xf32> to vector<6x16xf32>
    %74 = arith.addf %71, %73 : vector<6x16xf32>
    %cst_53 = arith.constant 0.000000e+00 : f32
    %75 = vector.broadcast %cst_53 : f32 to vector<6x16xf32>
    %76 = arith.maximumf %74, %75 : vector<6x16xf32>
    %c0_54 = arith.constant 0 : index
    %c0_55 = arith.constant 0 : index
    %77 = vector.load %arg17[%c0_54, %c0_55] : memref<6x16xf32, #tpu.memory_space<vmem>>, vector<6x16xf32>
    tpu.vector_store %arg17[%c0_54, %c0_55], %76 {strides = array<i32>} : memref<6x16xf32, #tpu.memory_space<vmem>>, vector<6x16xf32>,
    return
  }
}

</mosaic_0001>

<bundles_post_ra>
// kernel: tpu_custom_call.1
= control target key start
LH: loop header
LB: loop body
LE: loop exit
PB: predicated region body
PF: predicated region fallthrough
CT: control target
= control target key end

     0   :  { %s1028_s0 = inlined_call_operand.vmem [shape: f32[12,16], index: 0, kind: input, shape index: {}]   ;;  %s1029_s1 = inlined_call_operand.hbm [shape: f32[10,12], index: 1, kind: input, shape index: {}]   ;;  %s1030_s2 = inlined_call_operand.vmem [shape: f32[8,10], index: 2, kind: input, shape index: {}]   ;;  %s1031_s3 = inlined_call_operand.hbm [shape: f32[6,8], index: 3, kind: input, shape index: {}]   ;;  %s1032_s4 = inlined_call_operand.vmem [shape: f32[16,8], index: 4, kind: input, shape index: {}]   ;;  %s1033_s5 = inlined_call_operand.hbm [shape: f32[8,96], index: 5, kind: input, shape index: {}]   ;;  %s1034_s6 = inlined_call_operand.vmem [shape: f32[1,96], index: 6, kind: input, shape index: {}]   ;;  %s1035_s7 = inlined_call_operand.vmem [shape: f32[32,32], index: 7, kind: input, shape index: {}]   ;;  %s1036_s8 = inlined_call_operand.vmem [shape: f32[1,32], index: 8, kind: input, shape index: {}]   ;;  %s1037_s9 = inlined_call_operand.hbm [shape: f32[32,32], index: 9, kind: input, shape index: {}]   ;;  %s1038_s10 = inlined_call_operand.vmem [shape: f32[1,32], index: 10, kind: input, shape index: {}]   ;;  %s1039_s11 = inlined_call_operand.hbm [shape: f32[32,32], index: 11, kind: input, shape index: {}]   ;;  %s1040_s12 = inlined_call_operand.vmem [shape: f32[1,32], index: 12, kind: input, shape index: {}]   ;;  %s1041_s13 = inlined_call_operand.hbm [shape: f32[32,32], index: 13, kind: input, shape index: {}]   ;;  %s1042_s14 = inlined_call_operand.vmem [shape: f32[1,32], index: 14, kind: input, shape index: {}]   ;;  %s1043_s15 = inlined_call_operand.vmem [shape: f32[32,16], index: 15, kind: input, shape index: {}]   ;;  %s1044_s16 = inlined_call_operand.vmem [shape: f32[1,16], index: 16, kind: input, shape index: {}]   ;;  %s1045_s17 = inlined_call_operand.hbm [shape: f32[6,16], index: 17, kind: output, shape index: {}]  }
   0x1   :  { %1047 = sst [smem:[#allocation19_spill]] %s1028_s0 }
   0x2   :  { %1048 = sst [smem:[#allocation20_spill]] %s1029_s1 }
   0x3   :  { %22 = vsyncpa [#allocation3], 0 }
   0x4   :  { %23 = vsyncpa [#allocation6], 0 }
   0x5   :  { %24 = vsyncpa [#allocation9], 0 }
   0x6   :  { %25 = vsyncpa [#allocation12], 0  ;;  %s49_s26 = sshll.u32 %s1031_s3, 4  ;;  %s50_s26 = int_to_ptr.hbm [resolvable:$true] %s49_s26 }
   0x7   :  { %26 = vsyncpa [#allocation4], 0  ;;  %s834_s27 = smov [#allocation5]   ;;  %s78_s30 = sshll.u32 %s1037_s9, 4  ;;  %s79_s30 = int_to_ptr.hbm [resolvable:$true] %s78_s30 }
   0x8   :  { %s51_s28 = sshll.u32 %s834_s27, 4  ;;  %s835_s18 = smov [#allocation8]   ;;  %s52_s28 = int_to_ptr.vmem [resolvable:$true] %s51_s28 }
   0x9   :  { %54 = dma.hbm_to_vmem [thread:$0]  %s50_s26, 128, %s52_s28, [#allocation6]  }
   0xa   :  { %s80_s19 = sshll.u32 %s835_s18, 4  ;;  %s1049_s21 = sld [smem:[#allocation20_spill]]  ;;  %s81_s19 = int_to_ptr.vmem [resolvable:$true] %s80_s19 }
   0xb   :  { %s836_s3 = smov 128   ;;  %s837_s23 = smov 8  }
   0xc   :  { %86 = dma.hbm_to_vmem [thread:$0]  %s79_s30, 512, %s81_s19, [#allocation9], %s836_s3, %s836_s3, %s837_s23  }
   0xd   :  { %s62_s26 = sshll.u32 %s1033_s5, 4  ;;  %s838_s27 = smov [#allocation2]   ;;  %s63_s26 = int_to_ptr.hbm [resolvable:$true] %s62_s26 }
   0xe   :  { %s35_s28 = sshll.u32 %s838_s27, 4  ;;  %s839_s9 = smov [#allocation7]   ;;  %s36_s28 = int_to_ptr.vmem [resolvable:$true] %s35_s28 }
   0xf   :  { %s64_s29 = sshll.u32 %s839_s9, 4  ;;  %s93_s1 = sshll.u32 %s1039_s11, 4  ;;  %s65_s29 = int_to_ptr.vmem [resolvable:$true] %s64_s29  ;;  %s94_s1 = int_to_ptr.hbm [resolvable:$true] %s93_s1 }
  0x10   :  { %s33_s22 = sshll.u32 %s1049_s21, 4  ;;  %s108_s19 = sshll.u32 %s1041_s13, 4  ;;  %s34_s22 = int_to_ptr.hbm [resolvable:$true] %s33_s22  ;;  %s109_s19 = int_to_ptr.hbm [resolvable:$true] %s108_s19 }
  0x11   :  { %41 = dma.hbm_to_vmem [thread:$0]  %s34_s22, 256, %s36_s28, [#allocation3], %s836_s3, %s836_s3, %s837_s23  }
  0x12   :  { %67 = dma.hbm_to_vmem [thread:$0]  %s63_s26, 128, %s65_s29, [#allocation6]  }
  0x13   :  { %s840_s21 = smov [#allocation10]   ;;  %s841_s24 = smov [#allocation11]  }
  0x14   :  { %s95_s5 = sshll.u32 %s840_s21, 4  ;;  %s110_s22 = sshll.u32 %s841_s24, 4  ;;  %s96_s5 = int_to_ptr.vmem [resolvable:$true] %s95_s5  ;;  %s111_s22 = int_to_ptr.vmem [resolvable:$true] %s110_s22 }
  0x15   :  { %101 = dma.hbm_to_vmem [thread:$0]  %s94_s1, 512, %s96_s5, [#allocation9], %s836_s3, %s836_s3, %s837_s23  }
  0x16   :  { %116 = dma.hbm_to_vmem [thread:$0]  %s109_s19, 512, %s111_s22, [#allocation12], %s836_s3, %s836_s3, %s837_s23  }
  0x17   :  { %824 = dma.done.wait [#allocation3], 256  }
  0x18   :  { %825 = vsyncadd [#allocation3], 4294967040 }
  0x19   :  { %826 = dma.done.wait [#allocation6], 256  }
  0x1a   :  { %827 = vsyncadd [#allocation6], 4294967040 }
  0x1b   :  { %828 = dma.done.wait [#allocation9], 1024  }
  0x1c   :  { %829 = vsyncadd [#allocation9], 4294966272 }
  0x1d   :  { %830 = dma.done.wait [#allocation12], 512  }
  0x1e   :  { %831 = vsyncadd [#allocation12], 4294966784  ;;  %v154_v0 = vld [vmem:[%s1032_s4 + $0x8] sm:$0xff]  ;;  %v153_v1 = vld [vmem:[%s1032_s4] sm:$0xff]  ;;  %s1050_s3 = sld [smem:[#allocation19_spill]]  ;;  %vm157_vm0 = vcmask 130048  }
  0x1f   :  { %178 = vmatpush.msra.mxu0 %v154_v0  ;;  %v155_v4 = vld [vmem:[#allocation7] sm:$0xff]  ;;  %vm190_vm1 = vcmask 64512   ;;  %v648_v8 = vld [vmem:[%s1034_s6] ss:$0 sm:$0xff]  ;;  %s842_s0 = smov 64   ;;  %s843_s18 = smov 96  }
  0x20   :  { %212 = vmatpush.msra.mxu1 %v155_v4  ;;  %vm244_vm2 = vcmask 1043456   ;;  %vm274_vm3 = vcmask 261120   ;;  %vm433_vm4 = vcmask 257024   ;;  %v149_v18 = vld [vmem:[#allocation2] sm:$0xff]  ;;  %vm237_vm5 = vcmask 97280   ;;  %v235_v23 = vld [vmem:[%s1035_s7 + $0x18] sm:$0xff] }
  0x21   :  { %179 = vmatpush.msra.mxu0 %v153_v1  ;;  %v150_v22 = vld [vmem:[#allocation2 + $0x8] sm:$0x3]  ;;  %v234_v24 = vld [vmem:[%s1035_s7 + $0x10] sm:$0xff]  ;;  %293 = vmatpush.msra.mxu3 %v235_v23  ;;  %v232_v26 = vld [vmem:[%s1035_s7] sm:$0xff]  ;;  %v844_v47 = vmov 384.0   ;;  %vm381_vm7 = vcmask 1041408  }
  0x22   :  { %v233_v25 = vld [vmem:[%s1035_s7 + $0x8] sm:$0xff]  ;;  %v309_v27 = vld [vmem:[#allocation8 + $0x18] sm:$0xff]  ;;  %v308_v28 = vld [vmem:[#allocation8 + $0x10] sm:$0xff]  ;;  %654 = vrcp.f32 %v844_v47  ;;  %vm377_vm8 = vcmask 80896   ;;  %s597_s21 = sshll.u32 %s1045_s17, 4  ;;  %vm588_vm9 = vcmask 128000   ;;  %s598_s21 = int_to_ptr.hbm [resolvable:$true] %s597_s21 }
  0x23   :  { %294 = vmatpush.msra.mxu3 %v234_v24  ;;  %357 = vmatpush.msrb.mxu0 %v309_v27  ;;  %v307_v29 = vld [vmem:[#allocation8 + $0x8] sm:$0xff]  ;;  %v306_v30 = vld [vmem:[#allocation8] sm:$0xff]  ;;  %v458_v23 = vld [vmem:[#allocation11 + $0x10] sm:$0xff] }
  0x24   :  { %v147_v2 = vld [vmem:[%s1050_s3] sm:$0xff]  ;;  %v148_v3 = vld [vmem:[%s1050_s3 + $0x8] sm:$0xf] }
  0x25   :  { %610 = vmatmul.msk.f32.vlgmr.msra.gmra.mxu0 %vm157_vm0, %v147_v2  ;;  %295 = vmatpush.msra.mxu3 %v233_v25  ;;  %v649_v59 = vld [vmem:[%s1036_s8] ss:$0 sm:$0xff]  ;;  %v457_v24 = vld [vmem:[#allocation11 + $0x8] sm:$0xff] }
  0x26   :  { %358 = vmatpush.msrb.mxu0 %v308_v28  ;;  %v650_v60 = vld [vmem:[%s1038_s10] ss:$0 sm:$0xff]  ;;  %v536_v28 = vld [vmem:[%s1043_s15 + $0x18] sm:$0xff] }
  0x27   :  { %296 = vmatpush.msra.mxu3 %v232_v26  ;;  %v456_v25 = vld [vmem:[#allocation11] sm:$0xff] }
  0x28   :  { %359 = vmatpush.msrb.mxu0 %v307_v29  ;;  %v655_v49 = vpop.eup %654  ;;  %v535_v29 = vld [vmem:[%s1043_s15 + $0x10] sm:$0xff] }
  0x29   :  { %v447_v51 = vmul.f32 384.0, %v655_v49  ;;  %vm451_vm6 = vweird.f32 %v655_v49 }
  0x2a   :  { %360 = vmatpush.msrb.mxu0 %v306_v30  ;;  %v534_v30 = vld [vmem:[%s1043_s15 + $0x8] sm:$0xff] }
  0x2b   :  { %v448_v54 = vsub.f32 1.0, %v447_v51 }
  0x2d   :  { %611 = vmatmul.msk.f32.gmra.mxu0 %vm157_vm0, %v148_v3  ;;  %v449_v61 = vmul.f32 %v655_v49, %v448_v54 }
  0x2f   :  { %v450_v3 = vadd.f32 %v655_v49, %v449_v61 }
  0xa2   :  { %v181_v5 = vpop.f32.mrf.mxu0 }
  0xa3   :  { %612 = vmatmul.msk.f32.vlgmr.msra.gmra.mxu1 %vm190_vm1, %v181_v5 }
  0xaa   :  { %v184_v6 = vpop.f32.mrf.mxu0 }
  0xab   :  { %613 = vmatmul.msk.f32.gmra.mxu1 %vm190_vm1, %v184_v6 }
 0x120   :  { %v214_v7 = vpop.f32.mrf.mxu1 }
 0x121   :  { %v215_v12 = vadd.f32 %v648_v8, %v214_v7 }
 0x123   :  { %v220_v13 = vmax.f32 %v215_v12, 0.0 }
 0x128   :  { %v217_v9 = vpop.f32.mrf.mxu1 }
 0x129   :  { %v218_v10 = vadd.f32 %v648_v8, %v217_v9 }
 0x12b   :  { %v221_v11 = vmax.f32 %v218_v10, 0.0 }
 0x12d   :  { %513 = vrot.lane.b32.xlu2 %v221_v11, %s842_s0  ;;  %226 = vrot.lane.b32.xlu0 %v221_v11, %s843_s18 }
 0x135   :  { %224 = vrot.lane.b32.xlu0 %v220_v13, %s843_s18 }
 0x187   :  { %v514_v41 = vpop.permute.xlu2 %513 }
 0x188   :  { %v518_v44 = vsel %vm433_vm4, %v514_v41, 0.0 }
 0x19f   :  { %v227_v14 = vpop.permute.xlu0 %226 }
 0x1a0   :  { %619 = vmatpush.msk.msrb.mxu1 %vm244_vm2, %v227_v14  ;;  %v231_v15 = vadd.f32 %v227_v14, %v221_v11  ;;  %v434_v20 = vsel %vm433_vm4, %v227_v14, 0.0  ;;  %v452_v11 = vsel %vm451_vm6, %v655_v49, %v450_v3 }
 0x1a2   :  { %614 = vmatpush.msk.msra.mxu2 %vm244_vm2, %v231_v15  ;;  %v151_v15 = vld [vmem:[%s1030_s2] sm:$0xff] }
 0x1a7   :  { %v225_v16 = vpop.permute.xlu0 %224 }
 0x1a8   :  { %328 = vmatpush.msrb.mxu1 %v225_v16  ;;  %v230_v17 = vadd.f32 %v225_v16, %v220_v13  ;;  %v432_v19 = vsel %vm274_vm3, %v225_v16, 0.0 }
 0x1a9   :  { %v435_v21 = vadd.f32 %v434_v20, %v432_v19  ;;  %620 = vmatmul.msk.f32.vlgmr.msrb.gmra.mxu1 %vm237_vm5, %v149_v18  ;;  %v374_v19 = vld [vmem:[#allocation10 + $0x10] sm:$0xff]  ;;  %v373_v20 = vld [vmem:[#allocation10 + $0x8] sm:$0xff] }
 0x1aa   :  { %263 = vmatpush.msra.mxu2 %v230_v17  ;;  %552 = vmatpush.msra.mxu1 %v536_v28 }
 0x1ab   :  { %615 = vmatmul.msk.f32.vlgmr.msra.gmra.mxu2 %vm237_vm5, %v149_v18  ;;  %436 = vadd.xlane.f32.xlu1 %v435_v21  ;;  %v375_v18 = vld [vmem:[#allocation10 + $0x18] sm:$0xff]  ;;  %v372_v21 = vld [vmem:[#allocation10] sm:$0xff] }
 0x1ac   :  { %423 = vmatpush.msrb.mxu3 %v375_v18  ;;  %553 = vmatpush.msra.mxu1 %v535_v29 }
 0x1ae   :  { %424 = vmatpush.msrb.mxu3 %v374_v19  ;;  %554 = vmatpush.msra.mxu1 %v534_v30 }
 0x1b0   :  { %425 = vmatpush.msrb.mxu3 %v373_v20 }
 0x1b1   :  { %621 = vmatmul.msk.f32.gmra.mxu1 %vm237_vm5, %v150_v22 }
 0x1b2   :  { %426 = vmatpush.msrb.mxu3 %v372_v21 }
 0x1b3   :  { %616 = vmatmul.msk.f32.gmra.mxu2 %vm237_vm5, %v150_v22  ;;  %v459_v22 = vld [vmem:[#allocation11 + $0x18] sm:$0xff] }
 0x1c4   :  { %511 = vrot.lane.b32.xlu1 %v220_v13, %s842_s0 }
 0x21e   :  { %v437_v31 = vpop.xlane.xlu1 %436 }
 0x21f   :  { %v438_v32 = vrot.slane %v437_v31, 4 }
 0x221   :  { %v439_v33 = vadd.f32 %v438_v32, %v437_v31  ;;  %v533_v31 = vld [vmem:[%s1043_s15] sm:$0xff] }
 0x222   :  { %555 = vmatpush.msra.mxu1 %v533_v31 }
 0x223   :  { %v440_v34 = vrot.slane %v439_v33, 2 }
 0x225   :  { %v441_v35 = vadd.f32 %v440_v34, %v439_v33  ;;  %v651_v33 = vld [vmem:[%s1040_s12] ss:$0 sm:$0xff] }
 0x226   :  { %v330_v36 = vpop.f32.mrf.mxu1  ;;  %v652_v34 = vld [vmem:[%s1042_s14] ss:$0 sm:$0xff]  ;;  %s845_s14 = smov [#allocation13]  }
 0x227   :  { %v442_v37 = vrot.slane %v441_v35, 1  ;;  %622 = vmatmul.msk.f32.vlgmr.msrb.gmra.mxu0 %vm274_vm3, %v330_v36  ;;  %s595_s20 = sshll.u32 %s845_s14, 4  ;;  %s596_s20 = int_to_ptr.vmem [resolvable:$true] %s595_s20 }
 0x229   :  { %v443_v38 = vadd.f32 %v442_v37, %v441_v35 }
 0x22b   :  { %632 = vpush %v443_v38 }
 0x22e   :  { %v265_v39 = vpop.f32.mrf.mxu2  ;;  %v333_v40 = vpop.f32.mrf.mxu1 }
 0x22f   :  { %617 = vmatmul.msk.f32.vlgmr.msra.gmra.mxu3 %vm274_vm3, %v265_v39  ;;  %623 = vmatmul.msk.f32.gmra.mxu0 %vm274_vm3, %v333_v40 }
 0x230   :  { %502 = vmatpush.msra.mxu3 %v459_v22 }
 0x232   :  { %503 = vmatpush.msra.mxu3 %v458_v23 }
 0x234   :  { %504 = vmatpush.msra.mxu3 %v457_v24 }
 0x236   :  { %v268_v42 = vpop.f32.mrf.mxu2  ;;  %v512_v43 = vpop.permute.xlu1 %511  ;;  %505 = vmatpush.msra.mxu3 %v456_v25 }
 0x237   :  { %v517_v45 = vsel %vm274_vm3, %v512_v43, 0.0  ;;  %618 = vmatmul.msk.f32.gmra.mxu3 %vm274_vm3, %v268_v42 }
 0x238   :  { %v519_v46 = vadd.f32 %v518_v44, %v517_v45  ;;  %v152_v44 = vld [vmem:[#allocation5] sm:$0x3f] }
 0x23a   :  { %520 = vadd.xlane.f32.xlu2 %v519_v46  ;;  %v653_v46 = vld [vmem:[%s1044_s16] ss:$0 sm:$0xff] }
 0x25c   :  { %s633_s13 = spop %632 }
 0x25d   :  { %v445_v10 = vstv %s633_s13 }
 0x25e   :  { %v453_v13 = vmul.f32 %v452_v11, %v445_v10 }
 0x2a4   :  { %v362_v48 = vpop.f32.mrf.mxu0 }
 0x2a5   :  { %v363_v2 = vadd.f32 %v650_v60, %v362_v48 }
 0x2a7   :  { %v368_v8 = vmax.f32 %v363_v2, 0.0 }
 0x2ac   :  { %v365_v58 = vpop.f32.mrf.mxu0 }
 0x2ad   :  { %v521_v50 = vpop.xlane.xlu2 %520  ;;  %v366_v63 = vadd.f32 %v650_v60, %v365_v58 }
 0x2ae   :  { %v522_v52 = vrot.slane %v521_v50, 4 }
 0x2af   :  { %v369_v6 = vmax.f32 %v366_v63, 0.0 }
 0x2b0   :  { %v523_v53 = vadd.f32 %v522_v52, %v521_v50 }
 0x2b2   :  { %v524_v55 = vrot.slane %v523_v53, 2  ;;  %v298_v56 = vpop.f32.mrf.mxu3 }
 0x2b3   :  { %v299_v1 = vadd.f32 %v649_v59, %v298_v56 }
 0x2b4   :  { %v525_v57 = vadd.f32 %v524_v55, %v523_v53 }
 0x2b5   :  { %v304_v7 = vmax.f32 %v299_v1, 0.0 }
 0x2b6   :  { %v526_v62 = vrot.slane %v525_v57, 1 }
 0x2b7   :  { %v370_v14 = vadd.f32 %v368_v8, %v304_v7  ;;  %v454_v17 = vadd.f32 %v453_v13, %v304_v7 }
 0x2b8   :  { %v527_v0 = vadd.f32 %v526_v62, %v525_v57 }
 0x2ba   :  { %v301_v4 = vpop.f32.mrf.mxu3  ;;  %634 = vpush %v527_v0 }
 0x2bb   :  { %v302_v5 = vadd.f32 %v649_v59, %v301_v4 }
 0x2bd   :  { %v305_v9 = vmax.f32 %v302_v5, 0.0 }
 0x2bf   :  { %v371_v12 = vadd.f32 %v369_v6, %v305_v9  ;;  %v455_v16 = vadd.f32 %v453_v13, %v305_v9 }
 0x2c1   :  { %624 = vmatpush.msk.msrb.mxu2 %vm381_vm7, %v371_v12 }
 0x2c3   :  { %400 = vmatpush.msrb.mxu2 %v370_v14 }
 0x2c4   :  { %625 = vmatmul.msk.f32.vlgmr.msrb.gmra.mxu2 %vm377_vm8, %v151_v15 }
 0x2c5   :  { %627 = vmatpush.msk.msra.mxu2 %vm381_vm7, %v455_v16 }
 0x2c7   :  { %479 = vmatpush.msra.mxu2 %v454_v17 }
 0x2cc   :  { %628 = vmatmul.msk.f32.vlgmr.msra.gmra.mxu2 %vm377_vm8, %v151_v15 }
 0x2eb   :  { %s635_s1 = spop %634 }
 0x2ec   :  { %v529_v38 = vstv %s635_s1 }
 0x2ed   :  { %v530_v41 = vmul.f32 %v529_v38, %v452_v11 }
 0x347   :  { %v402_v26 = vpop.f32.mrf.mxu2 }
 0x348   :  { %626 = vmatmul.msk.f32.vlgmr.msrb.gmra.mxu3 %vm274_vm3, %v402_v26 }
 0x34f   :  { %v481_v27 = vpop.f32.mrf.mxu2 }
 0x350   :  { %629 = vmatmul.msk.f32.vlgmr.msra.gmra.mxu3 %vm274_vm3, %v481_v27 }
 0x3cb   :  { %v428_v32 = vpop.f32.mrf.mxu3 }
 0x3cc   :  { %v429_v35 = vadd.f32 %v651_v33, %v428_v32 }
 0x3ce   :  { %v431_v39 = vmax.f32 %v429_v35, 0.0 }
 0x3d3   :  { %v507_v36 = vpop.f32.mrf.mxu3 }
 0x3d4   :  { %v508_v37 = vadd.f32 %v652_v34, %v507_v36 }
 0x3d6   :  { %v510_v40 = vmax.f32 %v508_v37, 0.0 }
 0x3d8   :  { %v531_v42 = vadd.f32 %v510_v40, %v431_v39 }
 0x3da   :  { %v532_v43 = vadd.f32 %v531_v42, %v530_v41 }
 0x3dc   :  { %630 = vmatmul.msk.f32.vlgmr.msra.gmra.mxu1 %vm274_vm3, %v532_v43 }
 0x459   :  { %v557_v45 = vpop.f32.mrf.mxu1 }
 0x45a   :  { %582 = vmatpush.msra.mxu0 %v557_v45 }
 0x45b   :  { %631 = vmatmul.msk.f32.vlgmr.msra.gmra.mxu0 %vm190_vm1, %v152_v44 }
 0x4d8   :  { %v584_v47 = vpop.f32.mrf.mxu0 }
 0x4d9   :  { %v585_v48 = vadd.f32 %v653_v46, %v584_v47 }
 0x4db   :  { %v587_v49 = vmax.f32 %v585_v48, 0.0 }
 0x4dd   :  { %589 = vst.msk [vmem:[#allocation13] sm:$0x3f] %vm588_vm9, %v587_v49 }
 0x4de   :  { %600 = dma.vmem_to_hbm [thread:$0]  %s596_s20, 128, %s598_s21, [#allocation4]  }
 0x4df   :  { %832 = dma.done.wait [#allocation4], 128  }
 0x4e0   :  { %833 = vsyncadd [#allocation4], 4294967168 }
 0x4e1   :  { %605 = vsyncpa [#allocation3], 1 }
 0x4e2   :  { %606 = vsyncpa [#allocation6], 1 }
 0x4e3   :  { %607 = vsyncpa [#allocation9], 1 }
 0x4e4   :  { %608 = vsyncpa [#allocation12], 1 }
 0x4e5   :  { %609 = vsyncpa [#allocation4], 1 }

</bundles_post_ra>
